<compile_context>
chip_gen: v7x
topology: tpu7x:2x2x1
jax: 0.10.0
libtpu: 0.0.40
codegen_flags: <defaults>
</compile_context>

<pallas_src>
import functools

import jax
import jax.numpy as jnp
from jax import lax
from jax.experimental import pallas as pl
from jax.experimental.pallas import tpu as pltpu

_EPS = 1e-6  # matches SalLoss.eps

# Live (TB, N) f32 temporaries assumed by the VMEM sizing model.
_F32_TEMPS_SINGLE_PASS = 8   # p/s/f casts, p_n, s_n, products, log intermediate
_F32_TEMPS_PHASED = 6


def _vmem_capacity_bytes():
    """Per-core VMEM capacity, with a conservative fallback (v7x = 64 MiB/TC)."""
    try:
        cap = int(pltpu.get_tpu_info().vmem_capacity_bytes)
        if cap > 0:
            return cap
    except Exception:
        pass
    return 64 * 1024 * 1024


def _round_up(x, m):
    return (x + m - 1) // m * m


def _flatten_samples(x):
    """(B, ...) -> lane-dense (B, N); matches PyTorch's per-sample reductions."""
    assert x.ndim >= 2, x.shape
    return x.reshape(x.shape[0], -1)


# ---------------------------------------------------------------------------
# Path A: whole sample rows fit in VMEM -> single pass, batch axis is the grid.
# ---------------------------------------------------------------------------
def _sal_loss_rows_kernel(p_ref, s_ref, f_ref, out_ref, *, n_elems):
    p = p_ref[...].astype(jnp.float32)   # (TB, N)
    s = s_ref[...].astype(jnp.float32)
    f = f_ref[...].astype(jnp.float32)

    inv_n = jnp.float32(1.0 / n_elems)
    inv_nm1 = jnp.float32(1.0 / (n_elems - 1))   # torch.std default: ddof=1

    # ---- raw per-sample moments (one traversal; every loaded value is reused
    # for several accumulators; no centered (TB, N) temporaries). (TB, 1).
    sum_p = jnp.sum(p, axis=1, keepdims=True)
    sum_s = jnp.sum(s, axis=1, keepdims=True)
    sum_f = jnp.sum(f, axis=1, keepdims=True)
    sum_pp = jnp.sum(p * p, axis=1, keepdims=True)
    sum_ss = jnp.sum(s * s, axis=1, keepdims=True)
    sum_ps = jnp.sum(p * s, axis=1, keepdims=True)
    sum_ff = jnp.sum(f * f, axis=1, keepdims=True)
    sum_pf = jnp.sum(p * f, axis=1, keepdims=True)

    mean_p = sum_p * inv_n
    mean_s = sum_s * inv_n
    mean_f = sum_f * inv_n

    inv_sum_p = pl.reciprocal(sum_p)
    inv_sum_s = pl.reciprocal(sum_s)
    inv_sum_f = pl.reciprocal(sum_f)

    # ---- KL: the only remaining full-width pass.  Exact reciprocal-multiply
    # instead of an f32 divide (keeps the VALU slot short on v7x).
    p_n = p * inv_sum_p
    s_n = s * inv_sum_s
    kl = jnp.sum(s_n * jnp.log(s_n * pl.reciprocal(p_n + _EPS) + _EPS),
                 axis=1, keepdims=True)

    # ---- CC from raw moments (the std factors cancel in the correlation).
    # NOTE: sum(x^2) - sum(x)*mean(x) can lose precision for huge, low-variance
    # rows; validated against the centered reference at 1e-4.
    ss_pc = sum_pp - sum_p * mean_p
    ss_sc = sum_ss - sum_s * mean_s
    sum_pcsc = sum_ps - sum_p * mean_s
    cc = 1.0 - sum_pcsc * lax.rsqrt(ss_pc * ss_sc)

    # ---- NSS from raw moments:
    #   sum(((f-mf)/std_f) * f) = ss_fc / std_f
    #   sum(((p-mp)/std_p) * f) = (sum(p*f) - mp*sum_f) / std_p
    ss_fc = sum_ff - sum_f * mean_f
    std_p = jnp.sqrt(ss_pc * inv_nm1)
    std_f = jnp.sqrt(ss_fc * inv_nm1)
    nss = (ss_fc / std_f - (sum_pf - mean_p * sum_f) / std_p) * inv_sum_f

    out_ref[...] = kl + 0.5 * cc + 0.2 * nss     # (TB, 1) per-sample loss


def _pick_tile_batch(batch, per_row_bytes, budget_bytes):
    """Largest TB that is either B itself or a multiple-of-8 divisor of B and
    whose working set fits the budget.  Returns None -> use the two-phase path."""
    if batch * per_row_bytes <= budget_bytes:
        return batch
    max_tb = budget_bytes // per_row_bytes
    tb = min(batch, int(max_tb) // 8 * 8)
    while tb >= 8:
        if batch % tb == 0:
            return tb
        tb -= 8
    return None


def _sal_loss_rows(p, s, f, tb, vmem_limit):
    batch, n = p.shape
    kernel = functools.partial(_sal_loss_rows_kernel, n_elems=n)
    per_sample = pl.pallas_call(
        kernel,
        out_shape=jax.ShapeDtypeStruct((batch, 1), jnp.float32),
        grid_spec=pltpu.PrefetchScalarGridSpec(
            num_scalar_prefetch=0,
            grid=(batch // tb,),
            in_specs=[
                pl.BlockSpec((tb, n), lambda i: (i, 0)),
                pl.BlockSpec((tb, n), lambda i: (i, 0)),
                pl.BlockSpec((tb, n), lambda i: (i, 0)),
            ],
            out_specs=pl.BlockSpec((tb, 1), lambda i: (i, 0)),
        ),
        compiler_params=pltpu.CompilerParams(
            # Each grid step owns a distinct output tile -> safe to shard the
            # batch axis across TensorCores (v7x megacore); no-op on 1-TC parts.
            dimension_semantics=("parallel",),
            vmem_limit_bytes=vmem_limit,
        ),
    )(p, s, f)
    return jnp.sum(per_sample) / batch


# ---------------------------------------------------------------------------
# Path B: rows too large for VMEM -> N-tiled two-phase path.
# ---------------------------------------------------------------------------
def _moments_kernel(p_ref, s_ref, f_ref, mom_ref):
    """Accumulate the 8 per-sample raw moments over the N-tile grid axis."""
    j = pl.program_id(0)

    p = p_ref[...].astype(jnp.float32)   # (B, TN)
    s = s_ref[...].astype(jnp.float32)
    f = f_ref[...].astype(jnp.float32)

    partial = jnp.concatenate(
        [
            jnp.sum(p, axis=1, keepdims=True),
            jnp.sum(s, axis=1, keepdims=True),
            jnp.sum(f, axis=1, keepdims=True),
            jnp.sum(p * p, axis=1, keepdims=True),
            jnp.sum(s * s, axis=1, keepdims=True),
            jnp.sum(p * s, axis=1, keepdims=True),
            jnp.sum(f * f, axis=1, keepdims=True),
            jnp.sum(p * f, axis=1, keepdims=True),
        ],
        axis=1,
    )                                    # (B, 8)

    @pl.when(j == 0)
    def _():
        mom_ref[...] = jnp.zeros_like(mom_ref)

    mom_ref[...] += partial


def _kl_kernel(inv_ref, p_ref, s_ref, kl_ref):
    """Accumulate per-sample KL over the N-tile axis given finished row sums."""
    j = pl.program_id(0)

    p = p_ref[...].astype(jnp.float32)       # (B, TN)
    s = s_ref[...].astype(jnp.float32)
    inv_sum_p = inv_ref[:, 0:1]              # (B, 1)
    inv_sum_s = inv_ref[:, 1:2]

    p_n = p * inv_sum_p
    s_n = s * inv_sum_s
    # zero-padded columns give s_n == 0 -> contribute exactly 0 to the sum.
    partial = jnp.sum(s_n * jnp.log(s_n * pl.reciprocal(p_n + _EPS) + _EPS),
                      axis=1, keepdims=True)

    @pl.when(j == 0)
    def _():
        kl_ref[...] = jnp.zeros_like(kl_ref)

    kl_ref[...] += partial


def _sal_loss_phased(p, s, f, n_elems, tile_n, vmem_limit):
    batch, n_pad = p.shape               # already zero-padded to tile_n multiple
    n_steps = n_pad // tile_n

    row_specs = [
        pl.BlockSpec((batch, tile_n), lambda j: (0, j)),
        pl.BlockSpec((batch, tile_n), lambda j: (0, j)),
        pl.BlockSpec((batch, tile_n), lambda j: (0, j)),
    ]
    compiler_params = pltpu.CompilerParams(
        dimension_semantics=("arbitrary",),   # resident accumulators over N tiles
        vmem_limit_bytes=vmem_limit,
    )

    # Phase 1: per-sample raw moments.
    moments = pl.pallas_call(
        _moments_kernel,
        out_shape=jax.ShapeDtypeStruct((batch, 8), jnp.float32),
        grid_spec=pltpu.PrefetchScalarGridSpec(
            num_scalar_prefetch=0,
            grid=(n_steps,),
            in_specs=row_specs,
            out_specs=pl.BlockSpec((batch, 8), lambda j: (0, 0)),
        ),
        compiler_params=compiler_params,
    )(p, s, f)

    sum_p, sum_s, sum_f, sum_pp, sum_ss, sum_ps, sum_ff, sum_pf = (
        moments[:, i] for i in range(8))

    # Phase 2: KL needs the finished row sums before its full-width pass.
    inv_sums = jnp.stack([1.0 / sum_p, 1.0 / sum_s], axis=1).astype(jnp.float32)
    kl = pl.pallas_call(
        _kl_kernel,
        out_shape=jax.ShapeDtypeStruct((batch, 1), jnp.float32),
        grid_spec=pltpu.PrefetchScalarGridSpec(
            num_scalar_prefetch=0,
            grid=(n_steps,),
            in_specs=[pl.BlockSpec((batch, 2), lambda j: (0, 0))] + row_specs[:2],
            out_specs=pl.BlockSpec((batch, 1), lambda j: (0, 0)),
        ),
        compiler_params=compiler_params,
    )(inv_sums, p, s)[:, 0]

    # CC / NSS fold onto the 8 moments -> tiny (B,)-sized math, plain JAX.
    inv_n = 1.0 / n_elems
    inv_nm1 = 1.0 / (n_elems - 1)
    mean_p = sum_p * inv_n
    mean_s = sum_s * inv_n
    mean_f = sum_f * inv_n
    ss_pc = sum_pp - sum_p * mean_p
    ss_sc = sum_ss - sum_s * mean_s
    ss_fc = sum_ff - sum_f * mean_f
    cc = 1.0 - (sum_ps - sum_p * mean_s) * lax.rsqrt(ss_pc * ss_sc)
    std_p = jnp.sqrt(ss_pc * inv_nm1)
    std_f = jnp.sqrt(ss_fc * inv_nm1)
    nss = (ss_fc / std_f - (sum_pf - mean_p * sum_f) / std_p) / sum_f

    per_sample = kl + 0.5 * cc + 0.2 * nss
    return jnp.sum(per_sample) / batch


# ---------------------------------------------------------------------------
# Public wrapper.
# ---------------------------------------------------------------------------
def sal_loss(pred, smap, fix, *, vmem_budget_bytes=None, force_two_phase=False,
             tile_n=None):
    """Pallas implementation of SalLoss.forward(input=pred, smap=smap, fix=fix)."""
    p = _flatten_samples(pred)
    s = _flatten_samples(smap)
    f = _flatten_samples(fix)
    assert p.shape == s.shape == f.shape, (p.shape, s.shape, f.shape)
    batch, n = p.shape

    cap = _vmem_capacity_bytes()
    vmem_limit = int(cap * 3 // 4)
    if vmem_budget_bytes is None:
        vmem_budget_bytes = int(cap * 0.45)   # headroom for pipeline / scratch

    in_bytes = sum(jnp.dtype(x.dtype).itemsize for x in (p, s, f))

    tb = None
    if not force_two_phase:
        # Working set per sample row: double-buffered native-dtype DMA blocks
        # plus the live f32 temporaries of the single-pass kernel.
        per_row = n * (2 * in_bytes + _F32_TEMPS_SINGLE_PASS * 4)
        tb = _pick_tile_batch(batch, per_row, vmem_budget_bytes)

    if tb is not None:
        return _sal_loss_rows(p, s, f, tb, vmem_limit)

    # ---- N-tiled two-phase path (rows too large for VMEM, or forced) ----
    if tile_n is None:
        per_col = batch * (2 * in_bytes + _F32_TEMPS_PHASED * 4)
        tile_n = max(128, int(vmem_budget_bytes // per_col) // 128 * 128)
        tile_n = min(tile_n, _round_up(n, 128))
        # TODO(synk): for batches so large that even tile_n=128 overflows VMEM,
        # add a second (batch) grid axis to the two-phase kernels.
    assert tile_n % 128 == 0, tile_n

    n_pad = _round_up(n, tile_n)
    if n_pad != n:
        # Zero padding is exactly neutral: it adds 0 to every moment and the
        # KL term (0 * log(0 + eps) == 0).  The true n is passed separately.
        pad = ((0, 0), (0, n_pad - n))
        p = jnp.pad(p, pad)
        s = jnp.pad(s, pad)
        f = jnp.pad(f, pad)

    return _sal_loss_phased(p, s, f, n, tile_n, vmem_limit)


# ---------------------------------------------------------------------------
# Pure-JAX reference mirroring the PyTorch SalLoss.forward (centered math).
# ---------------------------------------------------------------------------
def _reference(pred, smap, fix):
    eps = 1e-6
    p = _flatten_samples(pred).astype(jnp.float32)
    s = _flatten_samples(smap).astype(jnp.float32)
    f = _flatten_samples(fix).astype(jnp.float32)

    def per_sample(pi, si, fi):
        # KL
        pn = pi / pi.sum()
        sn = si / si.sum()
        kl = (sn * jnp.log(sn / (pn + eps) + eps)).sum()
        # CC
        pz = (pi - pi.mean()) / jnp.std(pi, ddof=1)
        sz = (si - si.mean()) / jnp.std(si, ddof=1)
        cc = 1.0 - (pz * sz).sum() / jnp.sqrt((pz * pz).sum() * (sz * sz).sum())
        # NSS
        refz = (fi - fi.mean()) / jnp.std(fi, ddof=1)
        pz2 = (pi - pi.mean()) / jnp.std(pi, ddof=1)
        nss = (refz * fi - pz2 * fi).sum() / fi.sum()
        return 1.0 * kl + 0.5 * cc + 0.2 * nss

    per = jax.vmap(per_sample)(p, s, f)
    return per.sum() / p.shape[0]


if __name__ == "__main__":
    key = jax.random.PRNGKey(0)
    k1, k2, k3 = jax.random.split(key, 3)

    # --- Path A test (rows fit in VMEM) ---
    B, C, H, W = 2, 1, 16, 16
    # saliency-map-like strictly-positive inputs (keeps sums/stds non-degenerate)
    pred = jax.random.uniform(k1, (B, C, H, W), jnp.float32, minval=0.05, maxval=1.0)
    smap = jax.random.uniform(k2, (B, C, H, W), jnp.float32, minval=0.05, maxval=1.0)
    fix = jax.random.uniform(k3, (B, C, H, W), jnp.float32, minval=0.10, maxval=1.0)

    loss = sal_loss(pred, smap, fix)
    jax.block_until_ready(loss)
    ref = _reference(pred, smap, fix)
    # 1e-4 tolerance: the raw-moment rewrite trades a little f32 cancellation
    # for removing the centered full-width passes.
    assert jnp.allclose(loss, ref, rtol=1e-4, atol=1e-4), (loss, ref)

    # --- Path B test (forced N-tiled two-phase path, including N padding) ---
    B2, H2, W2 = 2, 24, 24   # N = 576 -> padded to 640 with tile_n = 128
    p2 = jax.random.uniform(k1, (B2, 1, H2, W2), jnp.float32, minval=0.05, maxval=1.0)
    s2 = jax.random.uniform(k2, (B2, 1, H2, W2), jnp.float32, minval=0.05, maxval=1.0)
    f2 = jax.random.uniform(k3, (B2, 1, H2, W2), jnp.float32, minval=0.10, maxval=1.0)

    loss2 = sal_loss(p2, s2, f2, force_two_phase=True, tile_n=128)
    jax.block_until_ready(loss2)
    ref2 = _reference(p2, s2, f2)
    assert jnp.allclose(loss2, ref2, rtol=1e-4, atol=1e-4), (loss2, ref2)

    print("KERNEL_OK")
</pallas_src>

<mosaic_0001>
module attributes {stable_mosaic.version = 11 : i64} {
  func.func @_sal_loss_rows_kernel(%arg0: i32, %arg1: memref<2x256xf32, #tpu.memory_space<vmem>>, %arg2: memref<2x256xf32, #tpu.memory_space<vmem>>, %arg3: memref<2x256xf32, #tpu.memory_space<vmem>>, %arg4: memref<2x1xf32, #tpu.memory_space<vmem>>) attributes {dimension_semantics = [#tpu.dimension_semantics<parallel>], iteration_bounds = array<i64: 1>, scalar_prefetch = 0 : i64, scratch_operands = 0 : i64, tpu.core_type = #tpu.core_type<tc>, window_params = [{transform_indices = @transform_0, window_bounds = array<i64: 2, 256>}, {transform_indices = @transform_1, window_bounds = array<i64: 2, 256>}, {transform_indices = @transform_2, window_bounds = array<i64: 2, 256>}, {transform_indices = @transform_3, window_bounds = array<i64: 2, 1>}]} {
    %c0 = arith.constant 0 : index
    %c0_0 = arith.constant 0 : index
    %0 = vector.load %arg1[%c0, %c0_0] : memref<2x256xf32, #tpu.memory_space<vmem>>, vector<2x256xf32>
    %c0_1 = arith.constant 0 : index
    %c0_2 = arith.constant 0 : index
    %1 = vector.load %arg2[%c0_1, %c0_2] : memref<2x256xf32, #tpu.memory_space<vmem>>, vector<2x256xf32>
    %c0_3 = arith.constant 0 : index
    %c0_4 = arith.constant 0 : index
    %2 = vector.load %arg3[%c0_3, %c0_4] : memref<2x256xf32, #tpu.memory_space<vmem>>, vector<2x256xf32>
    %cst = arith.constant dense<0.000000e+00> : vector<2xf32>
    %3 = vector.multi_reduction <add>, %0, %cst [1] : vector<2x256xf32> to vector<2xf32>
    %4 = vector.shape_cast %3 : vector<2xf32> to vector<2x1xf32>
    %cst_5 = arith.constant dense<0.000000e+00> : vector<2xf32>
    %5 = vector.multi_reduction <add>, %1, %cst_5 [1] : vector<2x256xf32> to vector<2xf32>
    %6 = vector.shape_cast %5 : vector<2xf32> to vector<2x1xf32>
    %cst_6 = arith.constant dense<0.000000e+00> : vector<2xf32>
    %7 = vector.multi_reduction <add>, %2, %cst_6 [1] : vector<2x256xf32> to vector<2xf32>
    %8 = vector.shape_cast %7 : vector<2xf32> to vector<2x1xf32>
    %9 = arith.mulf %0, %0 : vector<2x256xf32>
    %cst_7 = arith.constant dense<0.000000e+00> : vector<2xf32>
    %10 = vector.multi_reduction <add>, %9, %cst_7 [1] : vector<2x256xf32> to vector<2xf32>
    %11 = vector.shape_cast %10 : vector<2xf32> to vector<2x1xf32>
    %12 = arith.mulf %1, %1 : vector<2x256xf32>
    %cst_8 = arith.constant dense<0.000000e+00> : vector<2xf32>
    %13 = vector.multi_reduction <add>, %12, %cst_8 [1] : vector<2x256xf32> to vector<2xf32>
    %14 = vector.shape_cast %13 : vector<2xf32> to vector<2x1xf32>
    %15 = arith.mulf %0, %1 : vector<2x256xf32>
    %cst_9 = arith.constant dense<0.000000e+00> : vector<2xf32>
    %16 = vector.multi_reduction <add>, %15, %cst_9 [1] : vector<2x256xf32> to vector<2xf32>
    %17 = vector.shape_cast %16 : vector<2xf32> to vector<2x1xf32>
    %18 = arith.mulf %2, %2 : vector<2x256xf32>
    %cst_10 = arith.constant dense<0.000000e+00> : vector<2xf32>
    %19 = vector.multi_reduction <add>, %18, %cst_10 [1] : vector<2x256xf32> to vector<2xf32>
    %20 = vector.shape_cast %19 : vector<2xf32> to vector<2x1xf32>
    %21 = arith.mulf %0, %2 : vector<2x256xf32>
    %cst_11 = arith.constant dense<0.000000e+00> : vector<2xf32>
    %22 = vector.multi_reduction <add>, %21, %cst_11 [1] : vector<2x256xf32> to vector<2xf32>
    %23 = vector.shape_cast %22 : vector<2xf32> to vector<2x1xf32>
    %cst_12 = arith.constant 3.906250e-03 : f32
    %24 = vector.broadcast %cst_12 : f32 to vector<2x1xf32>
    %25 = arith.mulf %4, %24 : vector<2x1xf32>
    %cst_13 = arith.constant 3.906250e-03 : f32
    %26 = vector.broadcast %cst_13 : f32 to vector<2x1xf32>
    %27 = arith.mulf %6, %26 : vector<2x1xf32>
    %cst_14 = arith.constant 3.906250e-03 : f32
    %28 = vector.broadcast %cst_14 : f32 to vector<2x1xf32>
    %29 = arith.mulf %8, %28 : vector<2x1xf32>
    %30 = tpu.reciprocal %4 : vector<2x1xf32> -> vector<2x1xf32>
    %31 = tpu.reciprocal %6 : vector<2x1xf32> -> vector<2x1xf32>
    %32 = tpu.reciprocal %8 : vector<2x1xf32> -> vector<2x1xf32>
    %33 = vector.broadcast %30 : vector<2x1xf32> to vector<2x256xf32>
    %34 = arith.mulf %0, %33 : vector<2x256xf32>
    %35 = vector.broadcast %31 : vector<2x1xf32> to vector<2x256xf32>
    %36 = arith.mulf %1, %35 : vector<2x256xf32>
    %cst_15 = arith.constant 9.99999997E-7 : f32
    %37 = vector.broadcast %cst_15 : f32 to vector<2x256xf32>
    %38 = arith.addf %34, %37 : vector<2x256xf32>
    %39 = tpu.reciprocal %38 : vector<2x256xf32> -> vector<2x256xf32>
    %40 = arith.mulf %36, %39 : vector<2x256xf32>
    %cst_16 = arith.constant 9.99999997E-7 : f32
    %41 = vector.broadcast %cst_16 : f32 to vector<2x256xf32>
    %42 = arith.addf %40, %41 : vector<2x256xf32>
    %43 = math.log %42 : vector<2x256xf32>
    %44 = arith.mulf %36, %43 : vector<2x256xf32>
    %cst_17 = arith.constant dense<0.000000e+00> : vector<2xf32>
    %45 = vector.multi_reduction <add>, %44, %cst_17 [1] : vector<2x256xf32> to vector<2xf32>
    %46 = vector.shape_cast %45 : vector<2xf32> to vector<2x1xf32>
    %47 = arith.mulf %4, %25 : vector<2x1xf32>
    %48 = arith.subf %11, %47 : vector<2x1xf32>
    %49 = arith.mulf %6, %27 : vector<2x1xf32>
    %50 = arith.subf %14, %49 : vector<2x1xf32>
    %51 = arith.mulf %4, %27 : vector<2x1xf32>
    %52 = arith.subf %17, %51 : vector<2x1xf32>
    %53 = arith.mulf %48, %50 : vector<2x1xf32>
    %54 = math.rsqrt %53 : vector<2x1xf32>
    %55 = arith.mulf %52, %54 : vector<2x1xf32>
    %cst_18 = arith.constant 1.000000e+00 : f32
    %56 = vector.broadcast %cst_18 : f32 to vector<2x1xf32>
    %57 = arith.subf %56, %55 : vector<2x1xf32>
    %58 = arith.mulf %8, %29 : vector<2x1xf32>
    %59 = arith.subf %20, %58 : vector<2x1xf32>
    %cst_19 = arith.constant 0.00392156886 : f32
    %60 = vector.broadcast %cst_19 : f32 to vector<2x1xf32>
    %61 = arith.mulf %48, %60 : vector<2x1xf32>
    %62 = math.sqrt %61 : vector<2x1xf32>
    %cst_20 = arith.constant 0.00392156886 : f32
    %63 = vector.broadcast %cst_20 : f32 to vector<2x1xf32>
    %64 = arith.mulf %59, %63 : vector<2x1xf32>
    %65 = math.sqrt %64 : vector<2x1xf32>
    %66 = arith.divf %59, %65 : vector<2x1xf32>
    %67 = arith.mulf %25, %8 : vector<2x1xf32>
    %68 = arith.subf %23, %67 : vector<2x1xf32>
    %69 = arith.divf %68, %62 : vector<2x1xf32>
    %70 = arith.subf %66, %69 : vector<2x1xf32>
    %71 = arith.mulf %70, %32 : vector<2x1xf32>
    %cst_21 = arith.constant 5.000000e-01 : f32
    %72 = vector.broadcast %cst_21 : f32 to vector<2x1xf32>
    %73 = arith.mulf %72, %57 : vector<2x1xf32>
    %74 = arith.addf %46, %73 : vector<2x1xf32>
    %cst_22 = arith.constant 2.000000e-01 : f32
    %75 = vector.broadcast %cst_22 : f32 to vector<2x1xf32>
    %76 = arith.mulf %75, %71 : vector<2x1xf32>
    %77 = arith.addf %74, %76 : vector<2x1xf32>
    %c0_23 = arith.constant 0 : index
    %c0_24 = arith.constant 0 : index
    %78 = vector.load %arg4[%c0_23, %c0_24] : memref<2x1xf32, #tpu.memory_space<vmem>>, vector<2x1xf32>
    tpu.vector_store %arg4[%c0_23, %c0_24], %77 {strides = array<i32>} : memref<2x1xf32, #tpu.memory_space<vmem>>, vector<2x1xf32>,
    return
  }
  func.func @transform_0(%arg0: i32) -> (i32, i32) {
    %c0_i32 = arith.constant 0 : i32
    %c0_i32_0 = arith.constant 0 : i32
    return %arg0, %c0_i32 : i32, i32
  }
  func.func @transform_1(%arg0: i32) -> (i32, i32) {
    %c0_i32 = arith.constant 0 : i32
    %c0_i32_0 = arith.constant 0 : i32
    return %arg0, %c0_i32 : i32, i32
  }
  func.func @transform_2(%arg0: i32) -> (i32, i32) {
    %c0_i32 = arith.constant 0 : i32
    %c0_i32_0 = arith.constant 0 : i32
    return %arg0, %c0_i32 : i32, i32
  }
  func.func @transform_3(%arg0: i32) -> (i32, i32) {
    %c0_i32 = arith.constant 0 : i32
    %c0_i32_0 = arith.constant 0 : i32
    return %arg0, %c0_i32 : i32, i32
  }
}

</mosaic_0001>

<bundles_post_ra>
// kernel: tpu_custom_call.1
= control target key start
LH: loop header
LB: loop body
LE: loop exit
PB: predicated region body
PF: predicated region fallthrough
CT: control target
= control target key end

     0   :  { %8 = vsyncpa [#allocation3], 0  ;;  %s456_s0 = inlined_call_operand.hbm [shape: f32[2,256], index: 0, kind: input, shape index: {}]   ;;  %s457_s1 = inlined_call_operand.hbm [shape: f32[2,256], index: 1, kind: input, shape index: {}]   ;;  %s458_s2 = inlined_call_operand.vmem [shape: f32[2,256], index: 2, kind: input, shape index: {}]   ;;  %s459_s3 = inlined_call_operand.vmem [shape: f32[2,1], index: 3, kind: output, shape index: {}]  }
   0x1   :  { %9 = vsyncpa [#allocation5], 0  ;;  %s344_s12 = smov [#allocation2]   ;;  %s345_s14 = smov [#allocation4]  }
   0x2   :  { %s16_s13 = sshll.u32 %s344_s12, 4  ;;  %s26_s15 = sshll.u32 %s345_s14, 4  ;;  %s17_s13 = int_to_ptr.vmem [resolvable:$true] %s16_s13  ;;  %s27_s15 = int_to_ptr.vmem [resolvable:$true] %s26_s15 }
   0x3   :  { %s296_s18 = scalar_lea.hbm %s456_s0, 64 }
   0x4   :  { %p297_p0 = scmp.ne.s32.totalorder %s456_s0, %s296_s18  ;;  %p300_p1 = scmp.lt.u32.totalorder %s296_s18, %s456_s0 }
   0x6   :  { %p302_p2 = pnand %p300_p1, %p297_p0 }
   0x8   :  { %305 = shalt.err (!%p302_p2)
}
   0x9   :  { %s306_s23 = scalar_lea.vmem %s17_s13, 64  ;;  %p311_p4 = scmp.lt.s32.totalorder %s17_s13, %s17_s13 }
   0xa   :  { %p307_p3 = scmp.ne.s32.totalorder %s17_s13, %s306_s23  ;;  %p312_p5 = scmp.lt.s32.totalorder %s306_s23, %s306_s23 }
   0xc   :  { %p313_p6 = por %p312_p5, %p311_p4 }
   0xe   :  { %p314_p7 = pnand %p313_p6, %p307_p3 }
  0x10   :  { %317 = shalt.err (!%p314_p7)
}
  0x11   :  { %19 = dma.hbm_to_vmem [thread:$0]  %s456_s0, 64, %s17_s13, [#allocation3]  }
  0x12   :  { %s318_s28 = scalar_lea.hbm %s457_s1, 64 }
  0x13   :  { %p319_p8 = scmp.ne.s32.totalorder %s457_s1, %s318_s28  ;;  %p322_p9 = scmp.lt.u32.totalorder %s318_s28, %s457_s1 }
  0x15   :  { %p324_p10 = pnand %p322_p9, %p319_p8 }
  0x17   :  { %327 = shalt.err (!%p324_p10)
}
  0x18   :  { %s328_s6 = scalar_lea.vmem %s27_s15, 64  ;;  %p333_p12 = scmp.lt.s32.totalorder %s27_s15, %s27_s15 }
  0x19   :  { %p329_p11 = scmp.ne.s32.totalorder %s27_s15, %s328_s6  ;;  %p334_p13 = scmp.lt.s32.totalorder %s328_s6, %s328_s6 }
  0x1b   :  { %p335_p0 = por %p334_p13, %p333_p12 }
  0x1d   :  { %p336_p1 = pnand %p335_p0, %p329_p11 }
  0x1f   :  { %339 = shalt.err (!%p336_p1)
}
  0x20   :  { %29 = dma.hbm_to_vmem [thread:$0]  %s457_s1, 64, %s27_s15, [#allocation5]  }
  0x21   :  { %340 = dma.done.wait [#allocation3], 64  }
  0x22   :  { %341 = vsyncadd [#allocation3], 4294967232 }
  0x23   :  { %342 = dma.done.wait [#allocation5], 64  }
  0x24   :  { %343 = vsyncadd [#allocation5], 4294967232  ;;  %v45_v0 = vlaneseq  ;;  %v346_v1 = vmov 1983009808   ;;  %vm52_vm0 = vcmask 1041408   ;;  %vm264_vm5 = vcmask 1024  }
  0x25   :  { %v43_v2 = vunpack.c.l.s4 %v346_v1  ;;  %v40_v6 = vld [vmem:[%s458_s2] sm:$0xf]  ;;  %v402_v8 = vld [vmem:[#allocation4] sm:$0xf]  ;;  %v347_v57 = vmov 269488144  }
  0x26   :  { %v392_v3 = vshrl.u32 %v45_v0, 7  ;;  %v400_v7 = vld [vmem:[#allocation2] sm:$0xf]  ;;  %v107_v13 = vmul.f32 %v402_v8, %v402_v8  ;;  %v141_v14 = vmul.f32 %v40_v6, %v40_v6  ;;  %v183_v58 = vunpack.c.l.s4 %v347_v57 }
  0x27   :  { %v44_v4 = vunpack.c.0.s8 %v43_v2  ;;  %v90_v11 = vmul.f32 %v400_v7, %v400_v7  ;;  %v158_v15 = vmul.f32 %v40_v6, %v400_v7  ;;  %v124_v16 = vmul.f32 %v402_v8, %v400_v7 }
  0x28   :  { %v184_v63 = vunpack.c.0.s8 %v183_v58 }
  0x29   :  { %v395_v5 = vsub.s32 %v44_v4, %v392_v3 }
  0x2b   :  { %v81_v9 = vrot.slane %v40_v6, %v395_v5  ;;  %v48_v10 = vrot.slane %v400_v7, %v395_v5  ;;  %v65_v12 = vrot.slane %v402_v8, %v395_v5  ;;  %v98_v21 = vrot.slane %v90_v11, %v395_v5 }
  0x2c   :  { %v115_v24 = vrot.slane %v107_v13, %v395_v5  ;;  %v149_v27 = vrot.slane %v141_v14, %v395_v5  ;;  %v166_v28 = vrot.slane %v158_v15, %v395_v5  ;;  %v132_v44 = vrot.slane %v124_v16, %v395_v5 }
  0x2d   :  { %v82_v17 = vcombine.high %v81_v9, %v81_v9  ;;  %v85_v18 = vsel %vm52_vm0, %v81_v9, 0.0  ;;  %v49_v19 = vcombine.high %v48_v10, %v48_v10  ;;  %v53_v20 = vsel %vm52_vm0, %v48_v10, 0.0 }
  0x2e   :  { %v66_v22 = vcombine.high %v65_v12, %v65_v12  ;;  %v69_v23 = vsel %vm52_vm0, %v65_v12, 0.0  ;;  %v99_v31 = vcombine.high %v98_v21, %v98_v21  ;;  %v102_v32 = vsel %vm52_vm0, %v98_v21, 0.0 }
  0x2f   :  { %v86_v25 = vsel %vm52_vm0, %v82_v17, 0.0  ;;  %v54_v26 = vsel %vm52_vm0, %v49_v19, 0.0  ;;  %v116_v34 = vcombine.high %v115_v24, %v115_v24  ;;  %v150_v35 = vcombine.high %v149_v27, %v149_v27 }
  0x30   :  { %v87_v29 = vadd.f32 %v86_v25, %v85_v18  ;;  %v55_v30 = vadd.f32 %v54_v26, %v53_v20  ;;  %v70_v33 = vsel %vm52_vm0, %v66_v22, 0.0  ;;  %v103_v36 = vsel %vm52_vm0, %v99_v31, 0.0 }
  0x31   :  { %v71_v37 = vadd.f32 %v70_v33, %v69_v23  ;;  %v119_v38 = vsel %vm52_vm0, %v115_v24, 0.0  ;;  %v153_v39 = vsel %vm52_vm0, %v149_v27, 0.0  ;;  %v104_v40 = vadd.f32 %v103_v36, %v102_v32 }
  0x32   :  { %88 = vadd.xlane.f32.xlu1 %v87_v29  ;;  %56 = vadd.xlane.f32.xlu0 %v55_v30  ;;  %v120_v41 = vsel %vm52_vm0, %v116_v34, 0.0  ;;  %v154_v42 = vsel %vm52_vm0, %v150_v35, 0.0  ;;  %v167_v43 = vcombine.high %v166_v28, %v166_v28  ;;  %v133_v47 = vcombine.high %v132_v44, %v132_v44 }
  0x33   :  { %v121_v45 = vadd.f32 %v120_v41, %v119_v38  ;;  %v155_v46 = vadd.f32 %v154_v42, %v153_v39  ;;  %v170_v48 = vsel %vm52_vm0, %v166_v28, 0.0  ;;  %v136_v50 = vsel %vm52_vm0, %v132_v44, 0.0 }
  0x34   :  { %v171_v49 = vsel %vm52_vm0, %v167_v43, 0.0  ;;  %v137_v51 = vsel %vm52_vm0, %v133_v47, 0.0  ;;  %v187_v9 = vsub.s32 %v184_v63, %v392_v3 }
  0x35   :  { %v172_v52 = vadd.f32 %v171_v49, %v170_v48  ;;  %v138_v53 = vadd.f32 %v137_v51, %v136_v50 }
  0x36   :  { %105 = vadd.xlane.f32.xlu1 %v104_v40  ;;  %72 = vadd.xlane.f32.xlu0 %v71_v37 }
  0x3a   :  { %122 = vadd.xlane.f32.xlu1 %v121_v45  ;;  %156 = vadd.xlane.f32.xlu0 %v155_v46 }
  0x3e   :  { %173 = vadd.xlane.f32.xlu1 %v172_v52  ;;  %139 = vadd.xlane.f32.xlu0 %v138_v53 }
  0xbf   :  { %v437_v54 = vpop.xlane.xlu1 %88  ;;  %v57_v55 = vpop.xlane.xlu0 %56 }
  0xc0   :  { %v439_v56 = vmul.f32 0.00390625, %v57_v55  ;;  %276 = vrcp.f32 %v57_v55  ;;  %v177_v32 = vmul.f32 0.00390625, %v437_v54 }
  0xc2   :  { %v224_v61 = vmul.f32 %v439_v56, %v57_v55  ;;  %v254_v47 = vmul.f32 %v439_v56, %v437_v54 }
  0xc3   :  { %v106_v59 = vpop.xlane.xlu1 %105  ;;  %v73_v60 = vpop.xlane.xlu0 %72 }
  0xc4   :  { %v176_v62 = vmul.f32 0.00390625, %v73_v60  ;;  %v225_v4 = vsub.f32 %v106_v59, %v224_v61  ;;  %278 = vrcp.f32 %v73_v60 }
  0xc6   :  { %v226_v0 = vmul.f32 %v176_v62, %v73_v60  ;;  %v228_v1 = vmul.f32 %v176_v62, %v57_v55  ;;  %v236_v35 = vmul.f32 0.003921569, %v225_v4 }
  0xc7   :  { %v123_v2 = vpop.xlane.xlu1 %122  ;;  %v157_v12 = vpop.xlane.xlu0 %156 }
  0xc8   :  { %v227_v6 = vsub.f32 %v123_v2, %v226_v0  ;;  %vm239_vm3 = vcmp.eq.f32.partialorder %v236_v35, inf  ;;  %v242_v43 = vand.u32 2147483648, %v236_v35  ;;  %vm241_vm4 = vcmp.eq.f32.partialorder %v236_v35, 0.0 }
  0xca   :  { %v230_v10 = vmul.f32 %v227_v6, %v225_v4  ;;  %v277_v11 = vpop.eup %276 }
  0xcb   :  { %v188_v13 = vrot.slane %v277_v11, %v187_v9  ;;  %v140_v16 = vpop.xlane.xlu0 %139  ;;  %v174_v46 = vpop.xlane.xlu1 %173 }
  0xcc   :  { %280 = vrsqrt.f32 %v230_v10  ;;  %v229_v18 = vsub.f32 %v140_v16, %v228_v1  ;;  %v255_v50 = vsub.f32 %v174_v46, %v254_v47 }
  0xcd   :  { %v190_v14 = vmul.f32 %v188_v13, %v400_v7 }
  0xce   :  { %v279_v17 = vpop.eup %278 }
  0xcf   :  { %v201_v15 = vadd.f32 1e-06, %v190_v14  ;;  %v198_v20 = vrot.slane %v279_v17, %v187_v9 }
  0xd1   :  { %282 = vrcp.f32 %v201_v15  ;;  %v200_v22 = vmul.f32 %v198_v20, %v402_v8  ;;  %v234_v8 = vmul.f32 %v177_v32, %v437_v54 }
  0xd3   :  { %v235_v33 = vsub.f32 %v157_v12, %v234_v8 }
  0xd5   :  { %v244_v34 = vmul.f32 0.003921569, %v235_v33 }
  0xd6   :  { %v281_v19 = vpop.eup %280 }
  0xd7   :  { %v232_v21 = vmul.f32 %v281_v19, %v229_v18  ;;  %vm247_vm1 = vcmp.eq.f32.partialorder %v244_v34, inf  ;;  %v250_v39 = vand.u32 2147483648, %v244_v34  ;;  %vm249_vm2 = vcmp.eq.f32.partialorder %v244_v34, 0.0 }
  0xd9   :  { %v233_v55 = vsub.f32 1.0, %v232_v21 }
  0xdb   :  { %v283_v23 = vpop.eup %282  ;;  %v260_v58 = vmul.f32 0.5, %v233_v55 }
  0xdc   :  { %v203_v24 = vmul.f32 %v283_v23, %v200_v22 }
  0xde   :  { %v204_v3 = vadd.f32 1e-06, %v203_v24 }
  0xe0   :  { %284 = vlog2.f32 %v204_v3 }
  0xe1   :  { %286 = vrsqrt.f32 %v244_v34 }
  0xe2   :  { %288 = vrsqrt.f32 %v236_v35 }
  0xea   :  { %v285_v25 = vpop.eup %284 }
  0xeb   :  { %v206_v26 = vmul.f32 0.6931472, %v285_v25  ;;  %v287_v36 = vpop.eup %286 }
  0xec   :  { %v289_v37 = vpop.eup %288  ;;  %v246_v38 = vmul.f32 %v287_v36, %v244_v34 }
  0xed   :  { %v207_v27 = vmul.f32 %v206_v26, %v200_v22 }
  0xee   :  { %v248_v40 = vsel %vm247_vm1, %v244_v34, %v246_v38 }
  0xef   :  { %v215_v28 = vrot.slane %v207_v27, %v395_v5  ;;  %v238_v5 = vmul.f32 %v289_v37, %v236_v35  ;;  %v251_v42 = vsel %vm249_vm2, %v250_v39, %v248_v40 }
  0xf0   :  { %290 = vrcp.f32 %v251_v42 }
  0xf1   :  { %v216_v7 = vcombine.high %v215_v28, %v215_v28  ;;  %v219_v29 = vsel %vm52_vm0, %v215_v28, 0.0  ;;  %v240_v41 = vsel %vm239_vm3, %v236_v35, %v238_v5 }
  0xf2   :  { %v243_v44 = vsel %vm241_vm4, %v242_v43, %v240_v41 }
  0xf3   :  { %v220_v30 = vsel %vm52_vm0, %v216_v7, 0.0  ;;  %292 = vrcp.f32 %v243_v44 }
  0xf4   :  { %v221_v31 = vadd.f32 %v220_v30, %v219_v29  ;;  %294 = vrcp.f32 %v437_v54 }
  0xf6   :  { %222 = vadd.xlane.f32.xlu0 %v221_v31 }
  0xfa   :  { %v291_v45 = vpop.eup %290 }
  0xfb   :  { %v253_v49 = vmul.f32 %v291_v45, %v235_v33 }
  0xfd   :  { %v293_v48 = vpop.eup %292 }
  0xfe   :  { %v257_v51 = vmul.f32 %v293_v48, %v255_v50  ;;  %v295_v53 = vpop.eup %294 }
 0x100   :  { %v258_v52 = vsub.f32 %v253_v49, %v257_v51 }
 0x102   :  { %v259_v57 = vmul.f32 %v295_v53, %v258_v52 }
 0x104   :  { %v262_v60 = vmul.f32 0.2, %v259_v57 }
 0x183   :  { %v223_v59 = vpop.xlane.xlu0 %222 }
 0x184   :  { %v261_v61 = vadd.f32 %v260_v58, %v223_v59 }
 0x186   :  { %v263_v62 = vadd.f32 %v262_v60, %v261_v61 }
 0x188   :  { %265 = vst.msk [vmem:[%s459_s3] sm:$0x3] %vm264_vm5, %v263_v62 }
 0x189   :  { %270 = vsyncpa [#allocation3], 1 }
 0x18a   :  { %271 = vsyncpa [#allocation5], 1 }

</bundles_post_ra>
